<compile_context>
chip_gen: v5e
topology: v5e:2x2
jax: 0.10.0
libtpu: 0.0.40
codegen_flags: <defaults>
</compile_context>

<pallas_src>
import jax
import jax.numpy as jnp
from jax import lax
from jax.experimental import pallas as pl
from jax.experimental.pallas import tpu as pltpu


# ----------------------------- helpers --------------------------------------


def _round_up(v, m):
    return ((v + m - 1) // m) * m


def _vmem_capacity_bytes():
    """Physical VMEM of the current TPU generation (conservative fallback)."""
    try:
        return int(pltpu.get_tpu_info().vmem_capacity_bytes)
    except Exception:
        return 64 << 20  # v7x per-TensorCore VMEM (most restrictive)


def _vmem_limit(need_bytes, cap_bytes):
    # Actual need + slack, clamped with headroom below physical capacity for
    # compiler-internal scratch, semaphores and the lane-padded (tr,1)->(tr,128)
    # sum/scale buffers.
    clamp = (100 << 20) if cap_bytes >= (96 << 20) else (52 << 20)
    return int(min(max(need_bytes + (4 << 20), 16 << 20), clamp))


# ----------------------------- kernels ---------------------------------------


def _row_sum_single_kernel(x_ref, sum_ref):
    # Whole spatial extent fits in one block: single cross-lane reduce.
    sum_ref[...] = jnp.sum(x_ref[...].astype(jnp.float32), axis=1, keepdims=True)


def _make_row_sum_kernel(tr, tc, cols):
    """Multi-column-block spatial sum with a (tr, 128) VMEM accumulator."""
    n_chunks = tc // 128          # tc is a multiple of 128 in this path
    need_mask = (cols % tc) != 0  # ragged tail in the last column block

    def kernel(x_ref, sum_ref, acc_ref):
        j = pl.program_id(1)

        @pl.when(j == 0)
        def _():
            acc_ref[...] = jnp.zeros_like(acc_ref)

        if need_mask:
            lane = lax.broadcasted_iota(jnp.int32, (tr, 128), 1)
            col0 = j * tc

        # Fold lane-aligned 128-wide chunks into the accumulator (pure VPU
        # adds; the lone XLU cross-lane reduce is deferred to the last step).
        acc = acc_ref[...]
        for c in range(n_chunks):
            chunk = x_ref[:, c * 128:(c + 1) * 128].astype(jnp.float32)
            if need_mask:
                # OOB values of a partial edge block are unspecified -> mask.
                chunk = jnp.where(lane + (col0 + c * 128) < cols, chunk, 0.0)
            acc = acc + chunk
        acc_ref[...] = acc

        @pl.when(j == pl.num_programs(1) - 1)
        def _():
            sum_ref[...] = jnp.sum(acc_ref[...], axis=1, keepdims=True)

    return kernel


def _excite_kernel(x_ref, s_ref, o_ref):
    # (rows, 1) scale lane-broadcast against the tile.  Multiply in f32 (scale
    # stays f32; only the product is cast) — exact for f32 inputs, bit-closer
    # to the f32 reference for bf16, and free in the VPU slot budget.
    o_ref[...] = (x_ref[...].astype(jnp.float32) * s_ref[...]).astype(o_ref.dtype)


# ----------------------------- wrapper ---------------------------------------


def squeeze_excitation(x, w1, b1, w2, b2, *, tile_rows=None, tile_cols=None):
    """x: (B, C, H, W); w1: (se, C) [Conv2d(C->se, k=1)]; b1: (se,);
    w2: (C, se) [Conv2d(se->C, k=1)]; b2: (C,).  Returns (B, C, H, W)."""
    B, C, H, W = x.shape
    rows, cols = B * C, H * W
    dtype = x.dtype
    itemsize = jnp.dtype(dtype).itemsize
    sub = max(8, 32 // itemsize)            # sublane multiple: 8 f32, 16 bf16, 32 int8

    cap = _vmem_capacity_bytes()
    big_vmem = cap >= (96 << 20)            # v5e/v6e: 128 MiB; v7x: 64 MiB per TC

    # Generation-aware default tiles (per-buffer bytes-sized, lane-dense).
    if tile_rows is None:
        tile_rows = 512 if big_vmem else 256
    tile_rows = max(sub, _round_up(int(tile_rows), sub))
    if tile_cols is None:
        target_buf = (8 << 20) if big_vmem else (3 << 20)
        tile_cols = target_buf // (tile_rows * itemsize)
    tile_cols = max(128, (int(tile_cols) // 128) * 128)

    # ---- column (spatial) tiling: never pad HBM -----------------------------
    if cols <= tile_cols:
        tc = cols                            # full-dim block (legal even if not %128)
        n_cb = 1
    else:
        tc = tile_cols                       # multiple of 128; tail masked in-kernel
        n_cb = pl.cdiv(cols, tc)

    # ---- row tiling ----------------------------------------------------------
    if rows <= tile_rows:
        tr = rows
        # Give the "parallel" row axis >= 2 blocks when the layout rule allows,
        # so both v7x TensorCores get work even for small B*C.
        if rows >= 2 * sub:
            half = _round_up(pl.cdiv(rows, 2), sub)
            if half < rows:
                tr = half
    else:
        tr = tile_rows
    n_rb = pl.cdiv(rows, tr)

    # Lane-dense 2-D view (free reshape of contiguous NCHW); no padding/copy.
    x2d = x.reshape(rows, cols)

    # ---- Pass 1: tiled spatial sum -> (rows, 1) f32 --------------------------
    if n_cb == 1:
        sums = pl.pallas_call(
            _row_sum_single_kernel,
            out_shape=jax.ShapeDtypeStruct((rows, 1), jnp.float32),
            grid=(n_rb,),
            in_specs=[pl.BlockSpec((tr, tc), lambda i: (i, 0))],
            out_specs=pl.BlockSpec((tr, 1), lambda i: (i, 0)),
            compiler_params=pltpu.CompilerParams(
                dimension_semantics=("parallel",),
                vmem_limit_bytes=_vmem_limit(
                    2 * tr * tc * itemsize + 2 * tr * 128 * 4, cap),
            ),
        )(x2d)
    else:
        sums = pl.pallas_call(
            _make_row_sum_kernel(tr, tc, cols),
            out_shape=jax.ShapeDtypeStruct((rows, 1), jnp.float32),
            grid=(n_rb, n_cb),
            in_specs=[pl.BlockSpec((tr, tc), lambda i, j: (i, j))],
            out_specs=pl.BlockSpec((tr, 1), lambda i, j: (i, 0)),
            scratch_shapes=[pltpu.VMEM((tr, 128), jnp.float32)],
            compiler_params=pltpu.CompilerParams(
                dimension_semantics=("parallel", "arbitrary"),
                vmem_limit_bytes=_vmem_limit(
                    2 * tr * tc * itemsize + 2 * tr * 128 * 4 + tr * 128 * 4, cap),
            ),
        )(x2d)

    # ---- Tiny FC layers (1x1 convs on the squeezed vector) in plain JAX -----
    f32 = jnp.float32
    x_se = (sums[:, 0] / f32(cols)).reshape(B, C)                     # mean (B, C)
    h = x_se @ w1.astype(f32).T + b1.astype(f32)                      # (B, se)
    h = h * jax.nn.sigmoid(h)                                         # Swish
    s = h @ w2.astype(f32).T + b2.astype(f32)                         # (B, C)
    s = jax.nn.sigmoid(s)                                             # in [0, 1]
    scale = s.reshape(rows, 1)                                        # f32

    # ---- Pass 2: tiled excite (lane-broadcast multiply), in place over x2d --
    out2d = pl.pallas_call(
        _excite_kernel,
        out_shape=jax.ShapeDtypeStruct((rows, cols), dtype),
        grid=(n_rb, n_cb),
        in_specs=[
            pl.BlockSpec((tr, tc), lambda i, j: (i, j)),
            pl.BlockSpec((tr, 1), lambda i, j: (i, 0)),
        ],
        out_specs=pl.BlockSpec((tr, tc), lambda i, j: (i, j)),
        input_output_aliases={0: 0},   # excited output overwrites the x slab
        compiler_params=pltpu.CompilerParams(
            dimension_semantics=("parallel", "parallel"),
            vmem_limit_bytes=_vmem_limit(
                4 * tr * tc * itemsize + 2 * tr * 128 * 4, cap),
        ),
    )(x2d, scale)

    return out2d.reshape(B, C, H, W)


# ----------------------------- reference & test -------------------------------


def _reference(x, w1, b1, w2, b2):
    # Pure-JAX reference of the PyTorch forward.
    x_se = jnp.mean(x, axis=(-2, -1), keepdims=True)                   # (B,C,1,1)
    h = jnp.einsum('bcij,sc->bsij', x_se, w1) + b1[None, :, None, None]
    h = h * jax.nn.sigmoid(h)                                          # Swish
    s = jnp.einsum('bsij,cs->bcij', h, w2) + b2[None, :, None, None]
    s = jax.nn.sigmoid(s)
    return s * x


if __name__ == "__main__":
    key = jax.random.PRNGKey(0)
    k_x, k_w1, k_b1, k_w2, k_b2, k_x2 = jax.random.split(key, 6)

    # --- case 1: small shapes, single-block (full-dim) path -------------------
    B, C, H, W, SE = 2, 4, 16, 16, 2
    x = jax.random.normal(k_x, (B, C, H, W), dtype=jnp.float32)
    bound1 = 1.0 / (C ** 0.5)
    w1 = jax.random.uniform(k_w1, (SE, C), jnp.float32, -bound1, bound1)
    b1 = jax.random.uniform(k_b1, (SE,), jnp.float32, -bound1, bound1)
    bound2 = 1.0 / (SE ** 0.5)
    w2 = jax.random.uniform(k_w2, (C, SE), jnp.float32, -bound2, bound2)
    b2 = jax.random.uniform(k_b2, (C,), jnp.float32, -bound2, bound2)

    ref = _reference(x, w1, b1, w2, b2)
    out = jax.block_until_ready(squeeze_excitation(x, w1, b1, w2, b2))
    assert out.shape == (B, C, H, W)
    assert jnp.allclose(out, ref, atol=1e-5, rtol=1e-5), "case 1 mismatch"

    # --- case 2: ragged multi-block path (partial edge blocks, in-kernel
    #     tail masking, resident accumulator, >=2 row blocks) ------------------
    B2, C2, H2, W2, SE2 = 2, 8, 10, 20, 4     # rows=16, cols=200
    x2 = jax.random.normal(k_x2, (B2, C2, H2, W2), dtype=jnp.float32)
    bound1 = 1.0 / (C2 ** 0.5)
    w1b = jax.random.uniform(k_w1, (SE2, C2), jnp.float32, -bound1, bound1)
    b1b = jax.random.uniform(k_b1, (SE2,), jnp.float32, -bound1, bound1)
    bound2 = 1.0 / (SE2 ** 0.5)
    w2b = jax.random.uniform(k_w2, (C2, SE2), jnp.float32, -bound2, bound2)
    b2b = jax.random.uniform(k_b2, (C2,), jnp.float32, -bound2, bound2)

    ref2 = _reference(x2, w1b, b1b, w2b, b2b)
    out2 = jax.block_until_ready(
        squeeze_excitation(x2, w1b, b1b, w2b, b2b, tile_rows=8, tile_cols=128))
    assert out2.shape == (B2, C2, H2, W2)
    assert jnp.allclose(out2, ref2, atol=1e-5, rtol=1e-5), "case 2 mismatch"

    print("KERNEL_OK")
</pallas_src>

<mosaic_0001>
module attributes {stable_mosaic.version = 11 : i64} {
  func.func @_row_sum_single_kernel(%arg0: i32, %arg1: memref<8x256xf32, #tpu.memory_space<vmem>>, %arg2: memref<8x1xf32, #tpu.memory_space<vmem>>) attributes {dimension_semantics = [#tpu.dimension_semantics<parallel>], iteration_bounds = array<i64: 1>, scalar_prefetch = 0 : i64, scratch_operands = 0 : i64, tpu.core_type = #tpu.core_type<tc>, window_params = [{transform_indices = @transform_0, window_bounds = array<i64: 8, 256>}, {transform_indices = @transform_1, window_bounds = array<i64: 8, 1>}]} {
    %c0 = arith.constant 0 : index
    %c0_0 = arith.constant 0 : index
    %0 = vector.load %arg1[%c0, %c0_0] : memref<8x256xf32, #tpu.memory_space<vmem>>, vector<8x256xf32>
    %cst = arith.constant dense<0.000000e+00> : vector<8xf32>
    %1 = vector.multi_reduction <add>, %0, %cst [1] : vector<8x256xf32> to vector<8xf32>
    %2 = vector.shape_cast %1 : vector<8xf32> to vector<8x1xf32>
    %c0_1 = arith.constant 0 : index
    %c0_2 = arith.constant 0 : index
    %3 = vector.load %arg2[%c0_1, %c0_2] : memref<8x1xf32, #tpu.memory_space<vmem>>, vector<8x1xf32>
    tpu.vector_store %arg2[%c0_1, %c0_2], %2 {strides = array<i32>} : memref<8x1xf32, #tpu.memory_space<vmem>>, vector<8x1xf32>,
    return
  }
  func.func @transform_0(%arg0: i32) -> (i32, i32) {
    %c0_i32 = arith.constant 0 : i32
    %c0_i32_0 = arith.constant 0 : i32
    return %arg0, %c0_i32 : i32, i32
  }
  func.func @transform_1(%arg0: i32) -> (i32, i32) {
    %c0_i32 = arith.constant 0 : i32
    %c0_i32_0 = arith.constant 0 : i32
    return %arg0, %c0_i32 : i32, i32
  }
}

</mosaic_0001>

<bundles_post_ra>
// kernel: tpu_custom_call.1
= control target key start
LH: loop header
LB: loop body
LE: loop exit
PB: predicated region body
PF: predicated region fallthrough
CT: control target
= control target key end

     0   :  { %6 = vsyncpa [#allocation3], 0  ;;  %s61_s9 = smov [#allocation2]   ;;  %s78_s0 = inlined_call_operand.hbm [shape: f32[8,256], index: 0, kind: input, shape index: {}]   ;;  %s79_s1 = inlined_call_operand.vmem [shape: f32[8,1], index: 1, kind: output, shape index: {}]  }
   0x1   :  { %s12_s8 = sshll.u32 %s78_s0, 4  ;;  %s14_s10 = sshll.u32 %s61_s9, 4  ;;  %s13_s8 = int_to_ptr.hbm [resolvable:$true] %s12_s8  ;;  %s15_s10 = int_to_ptr.vmem [resolvable:$true] %s14_s10 }
   0x2   :  { %17 = dma.hbm_to_vmem [thread:$0]  %s13_s8, 256, %s15_s10, [#allocation3]  }
   0x3   :  { %59 = dma.done.wait [#allocation3], 256  }
   0x4   :  { %60 = vsyncadd [#allocation3], 4294967040  ;;  %v22_v0 = vld [vmem:[#allocation2] sm:$0xff]  ;;  %v23_v1 = vld [vmem:[#allocation2 + $0x8] sm:$0xff]  ;;  %vm27_vm0 = vcmask 7168  }
   0x5   :  { %v24_v2 = vadd.f32 %v23_v1, %v22_v0 }
   0x7   :  { %25 = vadd.xlane.f32.xlu0 %v24_v2 }
  0x7a   :  { %v26_v3 = vpop.xlane.xlu0 %25 }
  0x7b   :  { %28 = vst.msk [vmem:[%s79_s1] sm:$0xff] %vm27_vm0, %v26_v3 }
  0x7c   :  { %33 = vsyncpa [#allocation3], 1 }

</bundles_post_ra>
